<compile_context>
chip_gen: v6e
topology: v6e:2x2x1
jax: 0.10.0
libtpu: 0.0.40
codegen_flags: <defaults>
</compile_context>

<pallas_src>
import math

import jax
import jax.numpy as jnp
from jax.experimental import pallas as pl
from jax.experimental.pallas import tpu as pltpu

LANE = 128      # hidden / output channel dims padded to this (lane-dense streams & stores)
SUBLANE = 8


def _round_up(x, m):
    return (x + m - 1) // m * m


# ----------------------------- Pallas kernel --------------------------------
def _pointnet_conv_kernel(g_ref, p1_ref, w2_ref, b2_ref, out_ref, acc_ref):
    """One (tm centroids) x (Kc neighbors) tile of the per-edge MLP + max aggregation.

    g_ref  : (tm, Kc, Hp) bf16  gathered per-neighbor layer-1 terms  g[j] = [x_j,pos_j,1]@[W1;b1]
    p1_ref : (tm, Hp)     f32   per-centroid term                    p1[i] = pos_i @ W1[pos rows]
    w2_ref : (Hp, Cp)     bf16
    b2_ref : (1,  Cp)     f32
    out_ref: (tm, Cp)     f32   resident across the neighbor-chunk grid axis
    acc_ref: (tm, Cp)     f32   running max over neighbor chunks (VMEM scratch)
    """
    kc = pl.program_id(1)
    tm, kchunk, hp = g_ref.shape

    @pl.when(kc == 0)
    def _init():
        # Safe init: final activations are >= 0 (ReLU) and every centroid has >= 1 neighbor.
        acc_ref[...] = jnp.zeros_like(acc_ref)

    # Layer 1 per edge collapses to a VPU subtract + ReLU thanks to the per-point precompute.
    h1 = jnp.maximum(g_ref[...].astype(jnp.float32) - p1_ref[...][:, None, :], 0.0)

    # Layer 2 on the MXU: bf16 operands, f32 accumulation; bias + ReLU in f32.
    h1b = h1.reshape(tm * kchunk, hp).astype(jnp.bfloat16)
    h2 = jnp.dot(h1b, w2_ref[...], preferred_element_type=jnp.float32)
    h2 = jnp.maximum(h2 + b2_ref[...], 0.0)

    # Running 'max' aggregation over this neighbor chunk.
    acc_ref[...] = jnp.maximum(acc_ref[...], jnp.max(h2.reshape(tm, kchunk, -1), axis=1))

    @pl.when(kc == pl.num_programs(1) - 1)
    def _finalize():
        out_ref[...] = acc_ref[...].astype(out_ref.dtype)


def pointnet_conv_pallas(g_nbrs, p1_cen, w2p, b2p, *, tm, kc):
    Mp, K, Hp = g_nbrs.shape
    Cp = w2p.shape[1]
    assert Mp % tm == 0 and K % kc == 0

    return pl.pallas_call(
        _pointnet_conv_kernel,
        out_shape=jax.ShapeDtypeStruct((Mp, Cp), jnp.float32),
        grid_spec=pltpu.PrefetchScalarGridSpec(
            num_scalar_prefetch=0,
            grid=(Mp // tm, K // kc),                                # reduction (K) axis last
            in_specs=[
                pl.BlockSpec((tm, kc, Hp), lambda i, k: (i, k, 0)),  # lane-dense bf16 stream
                pl.BlockSpec((tm, Hp),     lambda i, k: (i, 0)),     # resident per M-tile
                # Constant index maps: DMA'd once by the pipeline; the default double
                # buffering only costs ~2x32 KiB here, so no custom pipeline_mode needed.
                pl.BlockSpec((Hp, Cp),     lambda i, k: (0, 0)),
                pl.BlockSpec((1, Cp),      lambda i, k: (0, 0)),
            ],
            out_specs=pl.BlockSpec((tm, Cp), lambda i, k: (i, 0)),   # lane-dense output
            scratch_shapes=[pltpu.VMEM((tm, Cp), jnp.float32)],      # running-max accumulator
        ),
        compiler_params=pltpu.CompilerParams(
            dimension_semantics=("parallel", "arbitrary"),
            vmem_limit_bytes=32 * 1024 * 1024,
        ),
    )(g_nbrs, p1_cen, w2p, b2p)


# ------------------------------ JAX glue -------------------------------------
def fps(pos, batch_offsets, ratio):
    """Farthest point sampling per batch segment (deterministic start at first point).
    # TODO(synk): PyG fps uses a random start point; deterministic start used here."""
    idx_all = []
    for start, end in batch_offsets:
        pos_b = pos[start:end]
        n = pos_b.shape[0]
        n_sample = int(math.ceil(ratio * n))

        def body(i, carry):
            sel, dist = carry
            nxt = jnp.argmax(dist).astype(jnp.int32)
            sel = sel.at[i].set(nxt)
            dist = jnp.minimum(dist, jnp.sum((pos_b - pos_b[nxt]) ** 2, axis=-1))
            return sel, dist

        sel0 = jnp.zeros((n_sample,), jnp.int32)           # slot 0 = start point (index 0)
        dist0 = jnp.sum((pos_b - pos_b[0]) ** 2, axis=-1)
        sel, _ = jax.lax.fori_loop(1, n_sample, body, (sel0, dist0))
        idx_all.append(sel + start)
    return jnp.concatenate(idx_all, axis=0)


def ball_query(pos, batch, cen_pos, cen_batch, r, K):
    """For each centroid, first K points (index order) within radius r in the same batch."""
    d2 = jnp.sum((cen_pos[:, None, :] - pos[None, :, :]) ** 2, axis=-1)     # [M, N]
    valid = (cen_batch[:, None] == batch[None, :]) & (d2 <= r * r)
    n = pos.shape[0]
    ar = jnp.arange(n, dtype=jnp.int32)[None, :]
    key = jnp.where(valid, ar, ar + n)                     # invalid pushed to the back
    _, nbr_idx = jax.lax.top_k(-key, K)                    # K smallest keys == first K valid
    nbr_idx = nbr_idx.astype(jnp.int32)
    nbr_valid = jnp.take_along_axis(valid, nbr_idx, axis=1)
    # TODO(synk): for large N, replace the dense [M, N] distance matrix with a bucketed /
    # Pallas ball-query kernel; at realistic point counts this glue dominates wall-clock.
    return nbr_idx, nbr_valid


def set_abstraction(x, pos, batch, batch_offsets, params, *, ratio, radius_r, max_nbrs=64):
    w1, b1, w2, b2 = params
    C_in = x.shape[1]
    H, C_out = w1.shape[1], w2.shape[1]

    idx = fps(pos, batch_offsets, ratio)                              # sampled centroid indices
    cen_pos, cen_batch = pos[idx], batch[idx]
    nbr_idx, nbr_valid = ball_query(pos, batch, cen_pos, cen_batch, radius_r, max_nbrs)
    M, K = nbr_idx.shape

    # ---- Layer-1 per-point precompute (takes layer 1 off the per-edge MXU path) ----------
    #   relu([x_j, pos_j - pos_i] @ W1 + b1) == relu(g[j] - p1[i])
    w1_x, w1_pos = w1[:C_in], w1[C_in:]
    pts_aug = jnp.concatenate([x, pos, jnp.ones((pos.shape[0], 1), jnp.float32)], axis=-1)
    w1_aug = jnp.concatenate([w1_x, w1_pos, b1.reshape(1, -1)], axis=0)
    g_pts = pts_aug @ w1_aug                                          # (N, H) f32
    p1_cen = cen_pos @ w1_pos                                         # (M, H) f32

    # ---- Padded, lane-dense layouts --------------------------------------------------------
    Hp, Cp = _round_up(H, LANE), _round_up(C_out, LANE)
    g_pts = jnp.pad(g_pts, ((0, 0), (0, Hp - H))).astype(jnp.bfloat16)
    p1_cen = jnp.pad(p1_cen, ((0, 0), (0, Hp - H)))

    # Invalid neighbor slots -> centroid's own index.  Correct because a slot can only be
    # invalid when the row has < K valid neighbors, in which case the centroid (d^2 = 0 <= r^2)
    # is itself among the valid neighbors, so duplicating its value never changes the max.
    safe_idx = jnp.where(nbr_valid, nbr_idx, idx[:, None].astype(jnp.int32))

    # TODO(synk): fuse this gather into the kernel (scalar-prefetch safe_idx + in-kernel DMA
    # gather of Hp-wide rows / whole-K slabs) to avoid the [M, K, Hp] HBM round trip.
    g_nbrs = jnp.take(g_pts, safe_idx, axis=0)                        # (M, K, Hp) bf16

    # ---- Tiling: tm <= 128, >= 4 parallel grid steps when possible (megacore); Kc = 16 ----
    tm = min(128, max(SUBLANE, (M // 4 // SUBLANE) * SUBLANE))
    kc = 16 if K % 16 == 0 else (8 if K % 8 == 0 else K)
    Mp = _round_up(M, tm)
    if Mp > M:                                                        # padded rows sliced off
        g_nbrs = jnp.pad(g_nbrs, ((0, Mp - M), (0, 0), (0, 0)))
        p1_cen = jnp.pad(p1_cen, ((0, Mp - M), (0, 0)))

    w2p = jnp.zeros((Hp, Cp), jnp.float32).at[:H, :C_out].set(w2).astype(jnp.bfloat16)
    b2p = jnp.zeros((1, Cp), jnp.float32).at[:, :C_out].set(b2.reshape(1, -1))

    out = pointnet_conv_pallas(g_nbrs, p1_cen, w2p, b2p, tm=tm, kc=kc)
    return out[:M, :C_out], cen_pos, cen_batch


def set_abstraction_ref(x, pos, batch, batch_offsets, params, *, ratio, radius_r, max_nbrs=64):
    """Pure-JAX f32 reference of the same forward pass (for a correctness check)."""
    w1, b1, w2, b2 = params
    idx = fps(pos, batch_offsets, ratio)
    cen_pos, cen_batch = pos[idx], batch[idx]
    nbr_idx, nbr_valid = ball_query(pos, batch, cen_pos, cen_batch, radius_r, max_nbrs)
    f = jnp.concatenate([x[nbr_idx], pos[nbr_idx] - cen_pos[:, None, :]], axis=-1)
    h = jax.nn.relu(f @ w1 + b1)
    h = jax.nn.relu(h @ w2 + b2)
    h = jnp.where(nbr_valid[..., None], h, -jnp.inf)
    return jnp.max(h, axis=1), cen_pos, cen_batch


# ------------------------------- main ----------------------------------------
if __name__ == "__main__":
    # Small, deterministic problem: 2 batches of 64 points, 4-dim features.
    key = jax.random.PRNGKey(0)
    k_pos, k_x, k_w1, k_b1, k_w2, k_b2 = jax.random.split(key, 6)

    N_per_batch, B, C_in = 64, 2, 4
    N = N_per_batch * B
    H, C_out = 32, 32
    ratio, radius_r = 0.5, 0.4

    pos = jax.random.uniform(k_pos, (N, 3), dtype=jnp.float32)
    x = jax.random.normal(k_x, (N, C_in), dtype=jnp.float32)
    batch = jnp.concatenate([jnp.full((N_per_batch,), b, jnp.int32) for b in range(B)])
    batch_offsets = [(b * N_per_batch, (b + 1) * N_per_batch) for b in range(B)]

    # PointNetConv local nn: Linear(C_in+3 -> H) + ReLU, Linear(H -> C_out) + ReLU.
    c_feat = C_in + 3
    w1 = jax.random.normal(k_w1, (c_feat, H), dtype=jnp.float32) * 0.1
    b1 = jax.random.normal(k_b1, (1, H), dtype=jnp.float32) * 0.1
    w2 = jax.random.normal(k_w2, (H, C_out), dtype=jnp.float32) * 0.1
    b2 = jax.random.normal(k_b2, (1, C_out), dtype=jnp.float32) * 0.1
    params = (w1, b1, w2, b2)

    x_out, pos_out, batch_out = set_abstraction(
        x, pos, batch, batch_offsets, params, ratio=ratio, radius_r=radius_r, max_nbrs=64
    )
    jax.block_until_ready((x_out, pos_out, batch_out))

    assert x_out.shape == (64, C_out)
    assert pos_out.shape == (64, 3)
    assert batch_out.shape == (64,)

    # Correctness check against the pure-JAX f32 reference (loose tol for bf16 MXU operands).
    ref_x, ref_pos, ref_batch = set_abstraction_ref(
        x, pos, batch, batch_offsets, params, ratio=ratio, radius_r=radius_r, max_nbrs=64
    )
    assert jnp.allclose(pos_out, ref_pos) and jnp.array_equal(batch_out, ref_batch)
    assert jnp.allclose(x_out, ref_x, atol=5e-2, rtol=5e-2), float(jnp.max(jnp.abs(x_out - ref_x)))

    print("KERNEL_OK")
</pallas_src>

<mosaic_0001>
module attributes {stable_mosaic.version = 11 : i64} {
  func.func @_pointnet_conv_kernel(%arg0: i32, %arg1: i32, %arg2: memref<16x16x128xbf16, #tpu.memory_space<vmem>>, %arg3: memref<16x128xf32, #tpu.memory_space<vmem>>, %arg4: memref<128x128xbf16, #tpu.memory_space<vmem>>, %arg5: memref<1x128xf32, #tpu.memory_space<vmem>>, %arg6: memref<16x128xf32, #tpu.memory_space<vmem>>, %arg7: memref<16x128xf32, #tpu.memory_space<vmem>>) attributes {dimension_semantics = [#tpu.dimension_semantics<parallel>, #tpu.dimension_semantics<arbitrary>], iteration_bounds = array<i64: 4, 4>, scalar_prefetch = 0 : i64, scratch_operands = 1 : i64, tpu.core_type = #tpu.core_type<tc>, window_params = [{transform_indices = @transform_0, window_bounds = array<i64: 16, 16, 128>}, {transform_indices = @transform_1, window_bounds = array<i64: 16, 128>}, {pipeline_mode = #tpu.pipeline_mode<synchronous>, transform_indices = @transform_2, window_bounds = array<i64: 128, 128>}, {pipeline_mode = #tpu.pipeline_mode<synchronous>, transform_indices = @transform_3, window_bounds = array<i64: 1, 128>}, {transform_indices = @transform_4, window_bounds = array<i64: 16, 128>}]} {
    %c0_i32 = arith.constant 0 : i32
    %0 = arith.cmpi eq, %arg1, %c0_i32 : i32
    %1 = arith.extui %0 : i1 to i32
    %c0_i32_0 = arith.constant 0 : i32
    %2 = arith.cmpi ne, %1, %c0_i32_0 : i32
    scf.if %2 {
      %cst_17 = arith.constant 0.000000e+00 : f32
      %28 = vector.broadcast %cst_17 : f32 to vector<16x128xf32>
      %c0_18 = arith.constant 0 : index
      %c0_19 = arith.constant 0 : index
      %29 = vector.load %arg7[%c0_18, %c0_19] : memref<16x128xf32, #tpu.memory_space<vmem>>, vector<16x128xf32>
      tpu.vector_store %arg7[%c0_18, %c0_19], %28 {strides = array<i32>} : memref<16x128xf32, #tpu.memory_space<vmem>>, vector<16x128xf32>,
    } else {
    }
    %c0 = arith.constant 0 : index
    %c0_1 = arith.constant 0 : index
    %c0_2 = arith.constant 0 : index
    %3 = vector.load %arg2[%c0, %c0_1, %c0_2] : memref<16x16x128xbf16, #tpu.memory_space<vmem>>, vector<16x16x128xbf16>
    %4 = arith.extf %3 : vector<16x16x128xbf16> to vector<16x16x128xf32>
    %c0_3 = arith.constant 0 : index
    %c0_4 = arith.constant 0 : index
    %5 = vector.load %arg3[%c0_3, %c0_4] : memref<16x128xf32, #tpu.memory_space<vmem>>, vector<16x128xf32>
    %6 = vector.shape_cast %5 : vector<16x128xf32> to vector<16x1x128xf32>
    %7 = vector.broadcast %6 : vector<16x1x128xf32> to vector<16x16x128xf32>
    %8 = arith.subf %4, %7 : vector<16x16x128xf32>
    %cst = arith.constant 0.000000e+00 : f32
    %9 = vector.broadcast %cst : f32 to vector<16x16x128xf32>
    %10 = arith.maximumf %8, %9 : vector<16x16x128xf32>
    %11 = vector.shape_cast %10 : vector<16x16x128xf32> to vector<256x128xf32>
    %12 = arith.truncf %11 : vector<256x128xf32> to vector<256x128xbf16>
    %c0_5 = arith.constant 0 : index
    %c0_6 = arith.constant 0 : index
    %13 = vector.load %arg4[%c0_5, %c0_6] : memref<128x128xbf16, #tpu.memory_space<vmem>>, vector<128x128xbf16>
    %cst_7 = arith.constant dense<0.000000e+00> : vector<256x128xf32>
    %14 = tpu.matmul %12, %13, %cst_7 {dimension_numbers = #tpu.dot_dimension_numbers<[1], [0], [0], [1], [0, 0, 1, 1], [], []>} : vector<256x128xbf16>, vector<128x128xbf16>, vector<256x128xf32> -> vector<256x128xf32>
    %c0_8 = arith.constant 0 : index
    %c0_9 = arith.constant 0 : index
    %15 = vector.load %arg5[%c0_8, %c0_9] : memref<1x128xf32, #tpu.memory_space<vmem>>, vector<1x128xf32>
    %16 = vector.broadcast %15 : vector<1x128xf32> to vector<256x128xf32>
    %17 = arith.addf %14, %16 : vector<256x128xf32>
    %cst_10 = arith.constant 0.000000e+00 : f32
    %18 = vector.broadcast %cst_10 : f32 to vector<256x128xf32>
    %19 = arith.maximumf %17, %18 : vector<256x128xf32>
    %c0_11 = arith.constant 0 : index
    %c0_12 = arith.constant 0 : index
    %20 = vector.load %arg7[%c0_11, %c0_12] : memref<16x128xf32, #tpu.memory_space<vmem>>, vector<16x128xf32>
    %21 = vector.shape_cast %19 : vector<256x128xf32> to vector<16x16x128xf32>
    %cst_13 = arith.constant dense<0xFF800000> : vector<16x128xf32>
    %22 = vector.multi_reduction <maximumf>, %21, %cst_13 [1] : vector<16x16x128xf32> to vector<16x128xf32>
    %23 = arith.maximumf %20, %22 : vector<16x128xf32>
    %c0_14 = arith.constant 0 : index
    %c0_15 = arith.constant 0 : index
    %24 = vector.load %arg7[%c0_14, %c0_15] : memref<16x128xf32, #tpu.memory_space<vmem>>, vector<16x128xf32>
    tpu.vector_store %arg7[%c0_14, %c0_15], %23 {strides = array<i32>} : memref<16x128xf32, #tpu.memory_space<vmem>>, vector<16x128xf32>,
    %c3_i32 = arith.constant 3 : i32
    %25 = arith.cmpi eq, %arg1, %c3_i32 : i32
    %26 = arith.extui %25 : i1 to i32
    %c0_i32_16 = arith.constant 0 : i32
    %27 = arith.cmpi ne, %26, %c0_i32_16 : i32
    scf.if %27 {
      %c0_17 = arith.constant 0 : index
      %c0_18 = arith.constant 0 : index
      %28 = vector.load %arg7[%c0_17, %c0_18] : memref<16x128xf32, #tpu.memory_space<vmem>>, vector<16x128xf32>
      %c0_19 = arith.constant 0 : index
      %c0_20 = arith.constant 0 : index
      %29 = vector.load %arg6[%c0_19, %c0_20] : memref<16x128xf32, #tpu.memory_space<vmem>>, vector<16x128xf32>
      tpu.vector_store %arg6[%c0_19, %c0_20], %28 {strides = array<i32>} : memref<16x128xf32, #tpu.memory_space<vmem>>, vector<16x128xf32>,
    } else {
    }
    return
  }
  func.func @transform_0(%arg0: i32, %arg1: i32) -> (i32, i32, i32) {
    %c0_i32 = arith.constant 0 : i32
    %c0_i32_0 = arith.constant 0 : i32
    return %arg0, %arg1, %c0_i32 : i32, i32, i32
  }
  func.func @transform_1(%arg0: i32, %arg1: i32) -> (i32, i32) {
    %c0_i32 = arith.constant 0 : i32
    %c0_i32_0 = arith.constant 0 : i32
    return %arg0, %c0_i32 : i32, i32
  }
  func.func @transform_2(%arg0: i32, %arg1: i32) -> (i32, i32) {
    %c0_i32 = arith.constant 0 : i32
    %c0_i32_0 = arith.constant 0 : i32
    %c0_i32_1 = arith.constant 0 : i32
    return %c0_i32, %c0_i32_0 : i32, i32
  }
  func.func @transform_3(%arg0: i32, %arg1: i32) -> (i32, i32) {
    %c0_i32 = arith.constant 0 : i32
    %c0_i32_0 = arith.constant 0 : i32
    %c0_i32_1 = arith.constant 0 : i32
    return %c0_i32, %c0_i32_0 : i32, i32
  }
  func.func @transform_4(%arg0: i32, %arg1: i32) -> (i32, i32) {
    %c0_i32 = arith.constant 0 : i32
    %c0_i32_0 = arith.constant 0 : i32
    return %arg0, %c0_i32 : i32, i32
  }
}

</mosaic_0001>

<bundles_post_ra>
// kernel: tpu_custom_call.1
= control target key start
LH: loop header
LB: loop body
LE: loop exit
PB: predicated region body
PF: predicated region fallthrough
CT: control target
= control target key end

     0   :  { %s2304_s0 = inlined_call_operand.hbm [shape: bf16[64,64,128], index: 0, kind: input, shape index: {}]   ;;  %s2305_s1 = inlined_call_operand.hbm [shape: f32[64,128], index: 1, kind: input, shape index: {}]   ;;  %s2306_s2 = inlined_call_operand.hbm [shape: bf16[128,128], index: 2, kind: input, shape index: {}]   ;;  %s2307_s3 = inlined_call_operand.vmem [shape: f32[1,128], index: 3, kind: input, shape index: {}]   ;;  %s2308_s4 = inlined_call_operand.hbm [shape: f32[64,128], index: 4, kind: output, shape index: {}]  }
   0x1   :  { %2323 = sst [smem:[#allocation27_spill]] %s2304_s0 }
   0x2   :  { %2324 = sst [smem:[#allocation28_spill]] %s2306_s2 }
   0x3   :  { %2325 = sst [smem:[#allocation29_spill]] %s2308_s4 }
   0x4   :  { %9 = vsyncpa [#allocation4], 0 }
   0x5   :  { %11 = vsyncpa [#allocation4 + $0x1], 0 }
   0x6   :  { %12 = vsyncpa [#allocation7], 0 }
   0x7   :  { %14 = vsyncpa [#allocation7 + $0x1], 0 }
   0x8   :  { %15 = vsyncpa [#allocation5], 0 }
   0x9   :  { %17 = vsyncpa [#allocation5 + $0x1], 0  ;;  %s1782_s15 = smov 0   ;;  %s1784_s16 = smov 0  }
   0xa   :  { %s1786_s17 = smov 0   ;;  %s1788_s18 = smov 0  }
   0xb   :  { %s1790_s19 = smov 0   ;;  %s1792_s20 = smov 0  }
   0xc   :  { %s1794_s21 = smov 0   ;;  %s1796_s22 = smov 0  }
   0xd   :  { %s1798_s23 = smov 0   ;;  %s1800_s24 = smov 0  }
   0xe   :  { %s1802_s25 = smov 0  }
   0xf LB: > { %2326 = sst [smem:[#allocation17_spill]] %s1698_s15  ;;  %s1836_s26 = sadd.s32 4294967295, %s1738_s25   ;;  %s1738_s25 = sphi %s1802_s25, %s23_s25   ;;  %s1734_s24 = sphi %s1800_s24, %s2370_s24   ;;  %s1730_s23 = sphi %s1798_s23, %s2362_s23   ;;  %s1726_s22 = sphi %s1796_s22, %s2369_s22   ;;  %s1722_s21 = sphi %s1794_s21, %s2361_s21   ;;  %s1718_s20 = sphi %s1792_s20, %s2360_s20   ;;  %s1714_s19 = sphi %s1790_s19, %s2368_s19   ;;  %s1710_s18 = sphi %s1788_s18, %s2367_s18   ;;  %s1706_s17 = sphi %s1786_s17, %s2366_s17   ;;  %s1702_s16 = sphi %s1784_s16, %s2365_s16   ;;  %s1698_s15 = sphi %s1782_s15, %s2364_s15  }
  0x10   : > { %2327 = sst [smem:[#allocation18_spill]] %s1718_s20  ;;  %s1212_s27 = sadd.s32 4294967294, %s1738_s25  }
  0x11   : > { %2328 = sst [smem:[#allocation19_spill]] %s1726_s22  ;;  %s32_s28 = sadd.s32 1, %s1730_s23 }
  0x12   : > { %2329 = sst [smem:[#allocation20_spill]] %s1730_s23  ;;  %s35_s29 = sadd.s32 1, %s1734_s24 }
  0x13   : > { %p33_p0 = scmp.ge.s32.totalorder %s32_s28, 4  ;;  %s44_s30 = sadd.s32 1, %s1718_s20 }
  0x14   : > { %p51_p1 = scmp.ne.s32.totalorder %s1718_s20, %s1714_s19  ;;  %p52_p2 = scmp.eq.s32.totalorder %s1738_s25, 0 }
  0x15   : > { %s2372_s28 = smov (%p33_p0, %s32_s28), 0  ;;  %s2374_s29 = smov (!%p33_p0, %s35_s29), %s1734_s24 }
  0x16   : > { %2330 = sst [smem:[#allocation21_spill]] %s2372_s28  ;;  %s40_s5 = ssub.s32 %s1730_s23, %s2372_s28 }
  0x17   : > { %p1852_p3 = por %p52_p2, %p51_p1  ;;  %p37_p4 = scmp.ge.s32.totalorder %s2374_s29, 4 }
  0x18   : > { %p57_p5 = scmp.ne.s32.totalorder %s1714_s19, %s1710_s18  ;;  %p2309_p6 = scmp.eq.s32.totalorder %s1836_s26, 0 }
  0x19   : > { %s70_s7 = sadd.s32 1, %s1706_s17  ;;  %s2376_s29 = smov (%p37_p4, %s2374_s29), 0 }
  0x1a   : > { %2332 = sst [smem:[#allocation22_spill]] %s2376_s29  ;;  %p1863_p7 = por %p2309_p6, %p57_p5 }
  0x1b   : > { %p77_p8 = scmp.ne.s32.totalorder %s1706_s17, %s1702_s16  ;;  %s39_s9 = ssub.s32 %s1734_s24, %s2376_s29 }
  0x1c   : > { %s2333_s8 = scalar_select %p1863_p7, 1, 0 }
  0x1d   : > { %p83_p9 = scmp.ne.s32.totalorder %s1702_s16, %s1698_s15  ;;  %s41_s10 = sor.u32 %s40_s5, %s39_s9 }
  0x1e   : > { %p68_p10 = scmp.eq.s32.totalorder %s39_s9, 0  ;;  %p42_p11 = scmp.eq.s32.totalorder %s41_s10, 0 }
  0x1f   : > { %p1878_p12 = por %p77_p8, %p52_p2  ;;  %p1893_p13 = por %p83_p9, %p2309_p6 }
  0x20   : > { %s1883_s12 = scalar_select %p68_p10, %s1706_s17, %s70_s7  }
  0x21   : > { %s2334_s11 = scalar_select %p1878_p12, 1, 0 }
  0x22   : > { %2335 = sst [smem:[#allocation23_spill]] %s1883_s12  ;;  %p149_p0 = scmp.eq.s32.totalorder %s1836_s26, 15 }
  0x23   : > { %s1886_s13 = scalar_select %p42_p11, %s1718_s20, %s44_s30  }
  0x24   : > { %s2337_s14 = scalar_select %p1893_p13, 1, 0 }
  0x25   : > { %2336 = sst [smem:[#allocation24_spill]] %s1886_s13  ;;  %p155_p1 = scmp.eq.s32.totalorder %s1212_s27, 15 }
  0x26   : > { %p1213_p4 = scmp.ge.s32.totalorder %s1738_s25, 1  ;;  %p1902_p5 = por %p149_p0, %p77_p8 }
  0x27   : > { %p162_p2 = scmp.lt.s32.totalorder %s1738_s25, 17  ;;  %p1910_p10 = por %p155_p1, %p83_p9 }
  0x28   : > { %s2338_s18 = scalar_select %p1902_p5, 1, 0 }
  0x29   : > { %s2340_s5 = scalar_select %p1910_p10, 1, 0 }
  0x2a   : > { %2339 = sst [smem:[#allocation25_spill]] %s2338_s18  ;;  %p1914_p11 = pnand %p1213_p4, %p162_p2 }
  0x2b   : > { %2341 = sst [smem:[#allocation26_spill]] %s2340_s5  ;;  %s1740_s7 = smov [#allocation8]  }
  0x2c   : > { %s174_s9 = sshll.u32 %s1740_s7, 4  ;;  %p1434_p6 = pneg %p1914_p11  ;;  %s175_s9 = int_to_ptr.vmem [resolvable:$true] %s174_s9 }
  0x2d   : > { %p2343_p8 = scmp.eq.s32.totalorder %s1836_s26, 0  ;;  %s1569_s27 = scalar_lea.vmem %s175_s9, 1024 }
  0x2e   : > { %p1570_p5 = scmp.ne.s32.totalorder %s175_s9, %s1569_s27  ;;  %p1577_p1 = scmp.lt.s32.totalorder %s175_s9, %s175_s9 }
  0x2f   : > { %p1435_p0 = pnand %p1434_p6, %p2343_p8  ;;  %p1578_p12 = scmp.lt.s32.totalorder %s1569_s27, %s1569_s27 }
  0x31   : > { %p1560_p13 = pneg %p1435_p0  ;;  %p1579_p10 = por %p1578_p12, %p1577_p1 }
  0x33   : > { %p1572_p7 = pnand %p1570_p5, %p1560_p13 }
  0x35   : > { %p1573_p9 = pneg %p1572_p7 }
  0x37   : > { %p1580_p4 = pnand %p1579_p10, %p1573_p9 }
  0x39   : > { %1583 = shalt.err (!%p1580_p4)
}
  0x3a   : > { %s1741_s10 = smov 64   ;;  %s1742_s29 = smov 4  }
  0x3b   : > { %s2344_s2 = sld [smem:[#allocation28_spill]]  ;;  %p1215_p2 = scmp.ge.s32.totalorder %s1738_s25, 16 }
  0x3d   : > { %187 = sbr.rel (%p1215_p2) target bundleno = 98 (0x62), region = 24 }
  0x41   : > { %1437 = dma.hbm_to_vmem [thread:$0]  (!%p1435_p0), %s2344_s2, 1024, %s175_s9, [#allocation7], %s1741_s10, %s1741_s10, %s1742_s29  }
  0x42   : > { %s191_s7 = sand.u32 1, %s1718_s20   ;;  %s1218_s27 = sshll.u32 %s1730_s23, 1 }
  0x43   : > { %s1216_s12 = sshll.u32 %s191_s7, 7  ;;  %s1247_s5 = sshll.u32 %s1734_s24, 7 }
  0x44   : > { %s202_s15 = sadd.s32 %s1247_s5, %s1218_s27  ;;  %s195_s4 = scalar_lea.vmem [#allocation3], %s1216_s12 }
  0x45   : > { %s217_s28 = sshll.u32 %s195_s4, 4  ;;  %s1220_s29 = sshll.u32 %s202_s15, 6  ;;  %s218_s28 = int_to_ptr.vmem [resolvable:$true] %s217_s28 }
  0x46   : > { %s1419_s13 = scalar_select %p1852_p3, [#allocation0], [#allocation12] }
  0x47   : > { %s1743_s9 = smov 512   ;;  %s1744_s2 = smov 128  }
  0x48   : > { %1420 = sst [smem:[#allocation11]] (%p1852_p3), %s1743_s9  ;;  %s1745_s23 = smov 2  }
  0x49   : > { %s209_s10 = sld [smem:[%s1419_s13]]   ;;  %s1746_s5 = smov 64  }
  0x4a   : > { %1421 = sst [smem:[#allocation11 + $0x1]] (%p1852_p3), %s1744_s2  ;;  %s1747_s27 = smov 4  }
  0x4b   : > { %1422 = sst [smem:[#allocation11 + $0x2]] (%p1852_p3), %s1745_s23  ;;  %s192_s20 = scalar_lea.sflag [#allocation4], %s191_s7 }
  0x4c   : > { %1423 = sst [smem:[#allocation11 + $0x3]] (%p1852_p3), %s1746_s5  ;;  %s1748_s2 = smov 131072  }
  0x4d   : > { %s2345_s0 = sld [smem:[#allocation27_spill]]  ;;  %s240_s23 = sand.u32 1, %s1738_s25  }
  0x4e   : > { %1424 = sst [smem:[#allocation11 + $0x4]] (%p1852_p3), %s1746_s5  ;;  %s242_s18 = sand.u32 1, %s1706_s17  }
  0x4f   : > { %1425 = sst [smem:[#allocation11 + $0x5]] (%p1852_p3), %s1747_s27  ;;  %s1221_s13 = sshll.u32 %s209_s10, 26 }
  0x50   : > { %s1222_s9 = sadd.s32 134217728, %s1221_s13  ;;  %s1223_s22 = sshll.u32 %s242_s18, 4 }
  0x51   : > { %s1248_s4 = sshll.u32 %s1734_s24, 8  ;;  %s241_s10 = scalar_lea.sflag [#allocation7], %s240_s23 }
  0x52   : > { %s250_s5 = scalar_lea.hbm %s2305_s1, %s1248_s4  ;;  %p2346_p7 = scmp.ne.s32.totalorder %s2334_s11, 0 }
  0x53   : > { %s204_s15 = scalar_lea.hbm %s2345_s0, %s1220_s29  ;;  %s244_s0 = scalar_lea.vmem [#allocation6], %s1223_s22 }
  0x54   : > { %1426 = dma.general (%p1852_p3), %s204_s15, 2048, %s218_s28, %s192_s20, %s1748_s2, [#allocation11], %s1222_s9, 0  }
  0x55   : > { %s251_s27 = sshll.u32 %s244_s0, 4  ;;  %s1749_s20 = smov [#allocation6]   ;;  %s252_s27 = int_to_ptr.vmem [resolvable:$true] %s251_s27 }
  0x56   : > { %s1596_s7 = scalar_lea.vmem %s252_s27, 256  ;;  %s1600_s6 = sshll.u32 %s1749_s20, 4  ;;  %s1601_s6 = int_to_ptr.vmem [resolvable:$false] %s1600_s6 }
  0x57   : > { %p1597_p6 = scmp.ne.s32.totalorder %s252_s27, %s1596_s7  ;;  %s1602_s28 = scalar_lea.vmem %s1601_s6, 512 }
  0x58   : > { %p1603_p13 = scmp.lt.s32.totalorder %s252_s27, %s1601_s6  ;;  %p1604_p5 = scmp.lt.s32.totalorder %s1602_s28, %s1596_s7 }
  0x59   : > { %p1598_p3 = pnand %p1597_p6, %p2346_p7 }
  0x5a   : > { %p1605_p10 = por %p1604_p5, %p1603_p13 }
  0x5b   : > { %p1599_p12 = pneg %p1598_p3 }
  0x5d   : > { %p1606_p8 = pnand %p1605_p10, %p1599_p12 }
  0x5f   : > { %1609 = shalt.err (!%p1606_p8)
}
  0x60   : > { %s1750_s18 = smov 128   ;;  %s1751_s22 = smov 8  }
  0x61   : > { %1427 = dma.hbm_to_vmem [thread:$0]  (%p2346_p7), %s250_s5, 256, %s252_s27, %s241_s10, %s1750_s18, %s1750_s18, %s1751_s22  }
  0x62 PF: > { %263 = sbr.rel (%p1914_p11) target bundleno = 442 (0x1ba), region = 36  ;;  %s265_s0 = sand.u32 (!%p1914_p11), 1, %s1714_s19  }
  0x63   : > { %s1227_s15 = sshll.u32 (!%p1914_p11), %s265_s0, 7  ;;  %s266_s13 = scalar_lea.sflag (!%p1914_p11), [#allocation4], %s265_s0 }
  0x64   : > { %s1961_s9 = scalar_lea.vmem (!%p1914_p11), [#allocation3], %s1227_s15  ;;  %p2347_p0 = scmp.ne.s32.totalorder (!%p1914_p11), %s2333_s8, 0 }
  0x67   : > { %1681 = dma.done.wait (%p2347_p0), %s266_s13, 2048  }
  0x68   : > { %1683 = vsyncadd (%p2347_p0), %s266_s13, 4294965248  ;;  %s274_s11 = sand.u32 1, %s1836_s26   ;;  %s276_s2 = sand.u32 1, %s1702_s16  }
  0x69   : > { %s1971_s30 = sshll.u32 %s276_s2, 4  ;;  %s275_s23 = scalar_lea.sflag [#allocation7], %s274_s11 }
  0x6a   : > { %s278_s4 = scalar_lea.vmem [#allocation6], %s1971_s30  ;;  %p2348_p11 = scmp.ne.s32.totalorder %s2337_s14, 0 }
  0x6c   : > { %1685 = dma.done.wait (%p2348_p11), %s275_s23, 256  }
  0x6d   : > { %1687 = vsyncadd (%p2348_p11), %s275_s23, 4294967040  ;;  %p2349_p9 = scmp.eq.s32.totalorder %s1836_s26, 0 }
  0x6f   : > { %1689 = dma.done.wait (%p2349_p9), [#allocation7], 1024   ;;  %p2350_p1 = pmov %p2349_p9 }
  0x70   : > { %s1983_s8 = scalar_lea.vmem [#allocation9], %s1971_s30  ;;  %p1231_p4 = scmp.ne.s32.totalorder %s1722_s21, 0 }
  0x71   : > { %1691 = vsyncadd (%p2350_p1), [#allocation7], 4294966272 }
  0x72   : > { %320 = sbr.rel (%p1231_p4) target bundleno = 121 (0x79), region = 52 }
  0x77   : > { %v1752_v0 = vmov 0.0  }
  0x78   : > { %321 = vst [vmem:[#allocation2] sm:$0xff] %v1752_v0  ;;  %322 = vst [vmem:[#allocation2 + $0x8] sm:$0xff] %v1752_v0 }
  0x79 PF: > { %v1548_v1 = vld [vmem:[#allocation8 + $0x38] sm:$0xff]   ;;  %v1549_v2 = vld [vmem:[#allocation8 + $0x30] sm:$0xff]   ;;  %v395_v3 = vlaneseq  ;;  %v1550_v4 = vld [vmem:[#allocation8 + $0x28] sm:$0xff]   ;;  %v1753_v12 = vmov 1966171168   ;;  %vm1043_vm0 = vcmask 1041409  }
  0x7a   : > { %1353 = vmatprep.subr.bf16.mxu0 %v1548_v1  ;;  %1401 = vmatprep.subr.bf16.mxu1 %v1548_v1  ;;  %v1551_v5 = vld [vmem:[#allocation8 + $0x20] sm:$0xff]   ;;  %v393_v13 = vunpack.c.l.s4 %v1753_v12  ;;  %v388_v15 = vld [vmem:[%s278_s4 + $0x8] sm:$0xff]  ;;  %v2009_v22 = vld [vmem:[%s1961_s9 + $0x10] sm:$0xff]   ;;  %vm1045_vm1 = vcmask 1042434   ;;  %vm1047_vm2 = vcmask 1043459   ;;  %vm1049_vm3 = vcmask 1044484  }
  0x7b   : > { %1354 = vmatpush3.bf16.msra.mxu0 %v1548_v1  ;;  %1409 = vmatpush3.bf16.msra.mxu1 %v1548_v1  ;;  %v396_v6 = vshrl.u32 %v395_v3, 7  ;;  %v1987_v7 = vld [vmem:[%s1961_s9] sm:$0xff]   ;;  %v2001_v16 = vld [vmem:[%s1961_s9 + $0x8] sm:$0xff]   ;;  %v440_v21 = vcombine.high %v388_v15, %v388_v15  ;;  %v2012_v23 = vld [vmem:[%s1961_s9 + $0x50] sm:$0xff]   ;;  %v1260_v33 = vunpack.c.l.bf16 %v2009_v22  ;;  %v1261_v34 = vunpack.c.h.bf16 %v2009_v22  ;;  %p1241_p2 = scmp.ne.s32.totalorder %s1722_s21, 3 }
  0x7c   : > { %1355 = vmatprep.subr.bf16.mxu0 %v1549_v2  ;;  %1402 = vmatprep.subr.bf16.mxu1 %v1549_v2  ;;  %v387_v8 = vld [vmem:[%s278_s4] sm:$0xff]  ;;  %v1252_v10 = vunpack.c.l.bf16 %v1987_v7  ;;  %v1253_v11 = vunpack.c.h.bf16 %v1987_v7  ;;  %v2004_v17 = vld [vmem:[%s1961_s9 + $0x48] sm:$0xff]   ;;  %v2015_v24 = vld [vmem:[%s1961_s9 + $0x18] sm:$0xff]   ;;  %v394_v25 = vunpack.c.0.s8 %v393_v13  ;;  %v1256_v26 = vunpack.c.l.bf16 %v2001_v16 }
  0x7d   : > { %v1992_v9 = vld [vmem:[%s1961_s9 + $0x40] sm:$0xff]   ;;  %v1996_v14 = vsub.s32 0, %v396_v6  ;;  %v391_v18 = vcombine.high %v387_v8, %v387_v8  ;;  %v1257_v27 = vunpack.c.h.bf16 %v2001_v16  ;;  %v1288_v28 = vunpack.c.l.bf16 %v2004_v17  ;;  %v2021_v29 = vld [vmem:[%s1961_s9 + $0x58] sm:$0xff]   ;;  %v2039_v41 = vld [vmem:[%s1961_s9 + $0x28] sm:$0xff]  }
  0x7e   : > { %v1284_v19 = vunpack.c.l.bf16 %v1992_v9  ;;  %v1285_v20 = vunpack.c.h.bf16 %v1992_v9  ;;  %v2024_v30 = vld [vmem:[%s1961_s9 + $0x20] sm:$0xff]   ;;  %v1552_v31 = vld [vmem:[#allocation8 + $0x18] sm:$0xff]   ;;  %v1289_v32 = vunpack.c.h.bf16 %v2004_v17  ;;  %v1292_v35 = vunpack.c.l.bf16 %v2012_v23  ;;  %v2052_v50 = vld [vmem:[%s1961_s9 + $0x68] sm:$0xff]  }
  0x7f   : > { %1356 = vmatpush3.bf16.msra.mxu0 %v1549_v2  ;;  %1410 = vmatpush3.bf16.msra.mxu1 %v1549_v2  ;;  %v2031_v36 = vld [vmem:[%s1961_s9 + $0x60] sm:$0xff]   ;;  %v2033_v37 = vsub.s32 %v394_v25, %v396_v6  ;;  %v1293_v38 = vunpack.c.h.bf16 %v2012_v23  ;;  %v1264_v39 = vunpack.c.l.bf16 %v2015_v24  ;;  %v1265_v40 = vunpack.c.h.bf16 %v2015_v24  ;;  %v1553_v51 = vld [vmem:[#allocation8 + $0x10] sm:$0xff]  }
  0x80   : > { %1357 = vmatprep.subr.bf16.mxu0 %v1550_v4  ;;  %1403 = vmatprep.subr.bf16.mxu1 %v1550_v4  ;;  %v1296_v42 = vunpack.c.l.bf16 %v2021_v29  ;;  %v1297_v43 = vunpack.c.h.bf16 %v2021_v29  ;;  %v1268_v44 = vunpack.c.l.bf16 %v2024_v30  ;;  %v1269_v45 = vunpack.c.h.bf16 %v2024_v30  ;;  %v2063_v60 = vld [vmem:[%s1961_s9 + $0x30] sm:$0xff]  }
  0x81   : > { %v398_v46 = vrot.slane %v387_v8, %v2033_v37  ;;  %v447_v47 = vrot.slane %v388_v15, %v2033_v37  ;;  %v2048_v48 = vrot.slane %v391_v18, %v2033_v37  ;;  %v1300_v49 = vunpack.c.l.bf16 %v2031_v36 }
  0x82   : > { %v1301_v52 = vunpack.c.h.bf16 %v2031_v36  ;;  %v2056_v53 = vrot.slane %v440_v21, %v2033_v37  ;;  %v1272_v54 = vunpack.c.l.bf16 %v2039_v41  ;;  %v1273_v55 = vunpack.c.h.bf16 %v2039_v41 }
  0x83   : > { %1358 = vmatpush3.bf16.msra.mxu0 %v1550_v4  ;;  %1411 = vmatpush3.bf16.msra.mxu1 %v1550_v4  ;;  %v406_v56 = vcombine.high %v398_v46, %v398_v46  ;;  %v414_v57 = vrot.slane %v398_v46, %v2033_v37  ;;  %v455_v58 = vcombine.high %v447_v47, %v447_v47  ;;  %v1304_v0 = vunpack.c.l.bf16 %v2052_v50 }
  0x84   : > { %1359 = vmatprep.subr.bf16.mxu0 %v1551_v5  ;;  %1404 = vmatprep.subr.bf16.mxu1 %v1551_v5  ;;  %v463_v59 = vrot.slane %v447_v47, %v2033_v37  ;;  %v2067_v61 = vrot.slane %v2048_v48, %v2033_v37  ;;  %v2071_v62 = vrot.slane %v2056_v53, %v2033_v37  ;;  %v1305_v4 = vunpack.c.h.bf16 %v2052_v50 }
  0x85   : > { %v407_v63 = vcombine.high %v2048_v48, %v2048_v48  ;;  %v436_v1 = vcombine.high %v414_v57, %v414_v57  ;;  %v492_v2 = vrot.slane %v414_v57, %v1996_v14  ;;  %v428_v8 = vrot.slane %v406_v56, %v2033_v37  ;;  %v1555_v57 = vld [vmem:[#allocation8] sm:$0xff]  }
  0x86   : > { %v485_v3 = vcombine.high %v463_v59, %v463_v59  ;;  %v524_v6 = vrot.slane %v463_v59, %v1996_v14  ;;  %v477_v12 = vrot.slane %v455_v58, %v2033_v37  ;;  %v1276_v13 = vunpack.c.l.bf16 %v2063_v60 }
  0x87   : > { %1360 = vmatpush3.bf16.msra.mxu0 %v1551_v5  ;;  %1412 = vmatpush3.bf16.msra.mxu1 %v1551_v5  ;;  %v1554_v5 = vld [vmem:[#allocation8 + $0x8] sm:$0xff]   ;;  %v569_v15 = vsub.f32 %v1252_v10, %v492_v2  ;;  %v570_v18 = vsub.f32 %v1253_v11, %v492_v2  ;;  %v500_v21 = vrot.slane %v436_v1, %v1996_v14  ;;  %vm1051_vm4 = vcmask 1045509  }
  0x88   : > { %1361 = vmatprep.subr.bf16.mxu0 %v1552_v31  ;;  %1405 = vmatprep.subr.bf16.mxu1 %v1552_v31  ;;  %v532_v22 = vrot.slane %v485_v3, %v1996_v14  ;;  %v585_v25 = vsub.f32 %v1284_v19, %v524_v6  ;;  %v496_v46 = vrot.slane %v428_v8, %v1996_v14  ;;  %vm1053_vm5 = vcmask 1046534  }
  0x89   : > { %v528_v47 = vrot.slane %v477_v12, %v1996_v14  ;;  %v601_v10 = vmax.f32 %v569_v15, 0.0  ;;  %v602_v56 = vmax.f32 %v570_v18, 0.0  ;;  %v573_v7 = vsub.f32 %v1260_v33, %v500_v21 }
  0x8a   : > { %v574_v11 = vsub.f32 %v1261_v34, %v500_v21  ;;  %v617_v58 = vmax.f32 %v585_v25, 0.0  ;;  %v571_v19 = vsub.f32 %v1256_v26, %v496_v46  ;;  %v572_v9 = vsub.f32 %v1257_v27, %v496_v46  ;;  %v1327_v21 = vld [vmem:[%s1961_s9 + $0x70] sm:$0xff]  }
  0x8b   : > { %1362 = vmatpush3.bf16.msra.mxu0 %v1552_v31  ;;  %1413 = vmatpush3.bf16.msra.mxu1 %v1552_v31  ;;  %v586_v31 = vsub.f32 %v1285_v20, %v524_v6  ;;  %v633_v20 = vpack.c.bf16 %v602_v56, %v601_v10  ;;  %v587_v1 = vsub.f32 %v1288_v28, %v528_v47  ;;  %v605_v33 = vmax.f32 %v573_v7, 0.0 }
  0x8c   : > { %1363 = vmatprep.subr.bf16.mxu0 %v1553_v51  ;;  %1406 = vmatprep.subr.bf16.mxu1 %v1553_v51  ;;  %v603_v2 = vmax.f32 %v571_v19, 0.0  ;;  %v604_v3 = vmax.f32 %v572_v9, 0.0  ;;  %v606_v6 = vmax.f32 %v574_v11, 0.0  ;;  %v589_v16 = vsub.f32 %v1292_v35, %v532_v22 }
  0x8d   : > { %v618_v59 = vmax.f32 %v586_v31, 0.0  ;;  %v619_v15 = vmax.f32 %v587_v1, 0.0  ;;  %v590_v27 = vsub.f32 %v1293_v38, %v532_v22  ;;  %v1277_v18 = vunpack.c.h.bf16 %v2063_v60  ;;  %1369 = vmatprep.mubr.bf16.mxu0 %v633_v20 }
  0x8e   : > { %v634_v17 = vpack.c.bf16 %v604_v3, %v603_v2  ;;  %v635_v28 = vpack.c.bf16 %v606_v6, %v605_v33  ;;  %v487_v46 = vcombine.high %v477_v12, %v477_v12  ;;  %v508_v23 = vrot.slane %v2067_v61, %v1996_v14 }
  0x8f   : > { %1364 = vmatpush3.bf16.msra.mxu0 %v1553_v51  ;;  %1414 = vmatpush3.bf16.msra.mxu1 %v1553_v51  ;;  %v588_v51 = vsub.f32 %v1289_v32, %v528_v47  ;;  %v641_v34 = vpack.c.bf16 %v618_v59, %v617_v58  ;;  %v438_v32 = vcombine.high %v428_v8, %v428_v8  ;;  %v622_v31 = vmax.f32 %v590_v27, 0.0 }
  0x90   : > { %1365 = vmatprep.subr.bf16.mxu0 %v1554_v5  ;;  %1407 = vmatprep.subr.bf16.mxu1 %v1554_v5  ;;  %v540_v35 = vrot.slane %v2071_v62, %v1996_v14  ;;  %v435_v38 = vrot.slane %v407_v63, %v2033_v37  ;;  %v536_v22 = vrot.slane %v487_v46, %v1996_v14  ;;  %v1308_v10 = vunpack.c.l.bf16 %v1327_v21 }
  0x91   : > { %v620_v26 = vmax.f32 %v588_v51, 0.0  ;;  %1385 = vmatprep.mubr.bf16.mxu1 %v641_v34  ;;  %v504_v47 = vrot.slane %v438_v32, %v1996_v14  ;;  %v456_v12 = vcombine.high %v2056_v53, %v2056_v53  ;;  %v577_v11 = vsub.f32 %v1268_v44, %v508_v23 }
  0x92   : > { %v578_v48 = vsub.f32 %v1269_v45, %v508_v23  ;;  %v591_v63 = vsub.f32 %v1296_v42, %v536_v22  ;;  %v593_v53 = vsub.f32 %v1300_v49, %v540_v35  ;;  %v512_v59 = vrot.slane %v435_v38, %v1996_v14 }
  0x93   : > { %1366 = vmatpush3.bf16.msra.mxu0 %v1554_v5  ;;  %1415 = vmatpush3.bf16.msra.mxu1 %v1554_v5  ;;  %v642_v25 = vpack.c.bf16 %v620_v26, %v619_v15  ;;  %v621_v5 = vmax.f32 %v589_v16, 0.0  ;;  %v575_v56 = vsub.f32 %v1264_v39, %v504_v47  ;;  %v576_v7 = vsub.f32 %v1265_v40, %v504_v47 }
  0x94   : > { %1367 = vmatprep.subr.bf16.mxu0 %v1555_v57  ;;  %1408 = vmatprep.subr.bf16.mxu1 %v1555_v57  ;;  %v594_v39 = vsub.f32 %v1301_v52, %v540_v35  ;;  %v609_v44 = vmax.f32 %v577_v11, 0.0  ;;  %v610_v30 = vmax.f32 %v578_v48, 0.0  ;;  %v623_v45 = vmax.f32 %v591_v63, 0.0  ;;  %v1320_v52 = vld [vmem:[%s1961_s9 + $0x38] sm:$0xff]  }
  0x95   : > { %v643_v8 = vpack.c.bf16 %v622_v31, %v621_v5  ;;  %v607_v24 = vmax.f32 %v575_v56, 0.0  ;;  %v608_v40 = vmax.f32 %v576_v7, 0.0  ;;  %v625_v58 = vmax.f32 %v593_v53, 0.0 }
  0x96   : > { %v626_v29 = vmax.f32 %v594_v39, 0.0  ;;  %v484_v49 = vrot.slane %v456_v12, %v2033_v37  ;;  %v1309_v36 = vunpack.c.h.bf16 %v1327_v21  ;;  %v637_v9 = vpack.c.bf16 %v610_v30, %v609_v44 }
  0x97   : > { %1368 = vmatpush3.bf16.msra.mxu0 %v1555_v57  ;;  %1416 = vmatpush3.bf16.msra.mxu1 %v1555_v57  ;;  %v592_v57 = vsub.f32 %v1297_v43, %v536_v22  ;;  %v636_v43 = vpack.c.bf16 %v608_v40, %v607_v24  ;;  %v437_v20 = vcombine.high %v2067_v61, %v2067_v61  ;;  %v1280_v6 = vunpack.c.l.bf16 %v1320_v52 }
  0x98   : > { %v486_v1 = vcombine.high %v2071_v62, %v2071_v62  ;;  %v645_v51 = vpack.c.bf16 %v626_v29, %v625_v58  ;;  %v579_v33 = vsub.f32 %v1272_v54, %v512_v59  ;;  %v580_v34 = vsub.f32 %v1273_v55, %v512_v59 }
  0x99   : > { %v624_v42 = vmax.f32 %v592_v57, 0.0  ;;  %v544_v2 = vrot.slane %v484_v49, %v1996_v14  ;;  %v516_v37 = vrot.slane %v437_v20, %v1996_v14  ;;  %v439_v15 = vcombine.high %v435_v38, %v435_v38  ;;  %v2162_v57 = vld [vmem:[%s2307_s3] ss:$0 sm:$0xff] }
  0x9a   : > { %1370 = vmatmul.mubr.bf16.vlgmr.msra.gmra.mxu0 %v634_v17  ;;  %1386 = vmatmul.mubr.bf16.vlgmr.msra.gmra.mxu1 %v642_v25  ;;  %v548_v3 = vrot.slane %v486_v1, %v1996_v14  ;;  %v611_v61 = vmax.f32 %v579_v33, 0.0  ;;  %v1281_v54 = vunpack.c.h.bf16 %v1320_v52  ;;  %v612_v17 = vmax.f32 %v580_v34, 0.0  ;;  %v1328_v25 = vld [vmem:[%s1961_s9 + $0x78] sm:$0xff]  }
  0x9b   : > { %1373 = vmatprep.mubr.bf16.mxu0 %v635_v28  ;;  %1389 = vmatprep.mubr.bf16.mxu1 %v643_v8  ;;  %v644_v19 = vpack.c.bf16 %v624_v42, %v623_v45  ;;  %v595_v62 = vsub.f32 %v1304_v0, %v544_v2  ;;  %v596_v26 = vsub.f32 %v1305_v4, %v544_v2  ;;  %v1312_v31 = vunpack.c.l.bf16 %v1328_v25 }
  0x9c   : > { %v581_v41 = vsub.f32 %v1276_v13, %v516_v37  ;;  %v582_v55 = vsub.f32 %v1277_v18, %v516_v37  ;;  %v597_v16 = vsub.f32 %v1308_v10, %v548_v3  ;;  %v598_v27 = vsub.f32 %v1309_v36, %v548_v3 }
  0x9d   : > { %v627_v28 = vmax.f32 %v595_v62, 0.0  ;;  %v628_v32 = vmax.f32 %v596_v26, 0.0  ;;  %v520_v21 = vrot.slane %v439_v15, %v1996_v14  ;;  %v1313_v60 = vunpack.c.h.bf16 %v1328_v25 }
  0x9e   : > { %v613_v0 = vmax.f32 %v581_v41, 0.0  ;;  %v614_v50 = vmax.f32 %v582_v55, 0.0  ;;  %v629_v4 = vmax.f32 %v597_v16, 0.0  ;;  %v630_v5 = vmax.f32 %v598_v27, 0.0 }
  0x9f   : > { %v488_v13 = vcombine.high %v484_v49, %v484_v49  ;;  %v638_v18 = vpack.c.bf16 %v612_v17, %v611_v61  ;;  %v646_v46 = vpack.c.bf16 %v628_v32, %v627_v28  ;;  %v583_v47 = vsub.f32 %v1280_v6, %v520_v21 }
  0xa0   : > { %v584_v23 = vsub.f32 %v1281_v54, %v520_v21  ;;  %v639_v35 = vpack.c.bf16 %v614_v50, %v613_v0  ;;  %v647_v38 = vpack.c.bf16 %v630_v5, %v629_v4  ;;  %vm1055_vm6 = vcmask 1047559  }
  0xa1   : > { %v552_v8 = vrot.slane %v488_v13, %v1996_v14  ;;  %v615_v10 = vmax.f32 %v583_v47, 0.0 }
  0xa2   : > { %1374 = vmatmul.mubr.bf16.gmra.mxu0 %v636_v43  ;;  %1390 = vmatmul.mubr.bf16.gmra.mxu1 %v644_v19  ;;  %v616_v56 = vmax.f32 %v584_v23, 0.0 }
  0xa3   : > { %1377 = vmatprep.mubr.bf16.mxu0 %v637_v9  ;;  %1393 = vmatprep.mubr.bf16.mxu1 %v645_v51  ;;  %v599_v22 = vsub.f32 %v1312_v31, %v552_v8  ;;  %v600_v12 = vsub.f32 %v1313_v60, %v552_v8 }
  0xa4   : > { %v640_v48 = vpack.c.bf16 %v616_v56, %v615_v10 }
  0xa5   : > { %v631_v7 = vmax.f32 %v599_v22, 0.0  ;;  %v632_v11 = vmax.f32 %v600_v12, 0.0 }
  0xa7   : > { %v648_v63 = vpack.c.bf16 %v632_v11, %v631_v7 }
  0xaa   : > { %1378 = vmatmul.mubr.bf16.gmra.mxu0 %v638_v18  ;;  %1394 = vmatmul.mubr.bf16.gmra.mxu1 %v646_v46 }
  0xab   : > { %1381 = vmatprep.mubr.bf16.mxu0 %v639_v35  ;;  %1397 = vmatprep.mubr.bf16.mxu1 %v647_v38 }
  0xb2   : > { %1382 = vmatmul.mubr.bf16.gmra.mxu0 %v640_v48  ;;  %1398 = vmatmul.mubr.bf16.gmra.mxu1 %v648_v63 }
 0x15a   : > { %v1371_v14 = vpop.f32.mrf.mxu0  ;;  %v1387_v53 = vpop.f32.mrf.mxu1 }
 0x15b   : > { %v763_v39 = vadd.f32 %v1371_v14, %v2162_v57  ;;  %v827_v24 = vadd.f32 %v1387_v53, %v2162_v57 }
 0x15c   : > { %v754_v40 = vpop.f32.mrf.mxu0  ;;  %v818_v44 = vpop.f32.mrf.mxu1 }
 0x15d   : > { %v755_v30 = vadd.f32 %v2162_v57, %v754_v40  ;;  %v819_v45 = vadd.f32 %v2162_v57, %v818_v44  ;;  %v883_v59 = vmax.f32 %v763_v39, 0.0  ;;  %v899_v49 = vmax.f32 %v827_v24, 0.0 }
 0x15e   : > { %v1372_v42 = vpop.f32.mrf.mxu0  ;;  %v1388_v58 = vpop.f32.mrf.mxu1 }
 0x15f   : > { %v766_v29 = vadd.f32 %v1372_v42, %v2162_v57  ;;  %v830_v43 = vadd.f32 %v1388_v58, %v2162_v57  ;;  %v881_v51 = vmax.f32 %v755_v30, 0.0  ;;  %v897_v33 = vmax.f32 %v819_v45, 0.0 }
 0x160   : > { %v757_v36 = vpop.f32.mrf.mxu0  ;;  %v821_v52 = vpop.f32.mrf.mxu1 }
 0x161   : > { %v884_v19 = vmax.f32 %v766_v29, 0.0  ;;  %v900_v9 = vmax.f32 %v830_v43, 0.0  ;;  %v758_v20 = vadd.f32 %v2162_v57, %v757_v36  ;;  %v822_v1 = vadd.f32 %v2162_v57, %v821_v52 }
 0x162   : > { %v1375_v34 = vpop.f32.mrf.mxu0  ;;  %v1391_v2 = vpop.f32.mrf.mxu1 }
 0x163   : > { %v922_v37 = vmax.f32 %v883_v59, %v884_v19  ;;  %v978_v3 = vmax.f32 %v899_v49, %v900_v9  ;;  %v882_v6 = vmax.f32 %v758_v20, 0.0  ;;  %v898_v15 = vmax.f32 %v822_v1, 0.0 }
 0x164   : > { %v779_v61 = vadd.f32 %v1375_v34, %v2162_v57  ;;  %v770_v62 = vpop.f32.mrf.mxu0  ;;  %v834_v26 = vpop.f32.mrf.mxu1  ;;  %v843_v27 = vadd.f32 %v1391_v2, %v2162_v57 }
 0x165   : > { %v923_v54 = vrot.slane %v922_v37, 4  ;;  %v979_v41 = vrot.slane %v978_v3, 4  ;;  %v915_v55 = vmax.f32 %v881_v51, %v882_v6  ;;  %v971_v16 = vmax.f32 %v897_v33, %v898_v15 }
 0x166   : > { %v1376_v17 = vpop.f32.mrf.mxu0  ;;  %v1392_v28 = vpop.f32.mrf.mxu1  ;;  %v771_v25 = vadd.f32 %v2162_v57, %v770_v62  ;;  %v835_v0 = vadd.f32 %v2162_v57, %v834_v26  ;;  %v887_v46 = vmax.f32 %v779_v61, 0.0  ;;  %v903_v10 = vmax.f32 %v843_v27, 0.0 }
 0x167   : > { %v924_v32 = vmax.f32 %v922_v37, %v923_v54  ;;  %v916_v21 = vrot.slane %v915_v55, 4  ;;  %v972_v50 = vrot.slane %v971_v16, 4  ;;  %v782_v4 = vadd.f32 %v1376_v17, %v2162_v57 }
 0x168   : > { %v846_v5 = vadd.f32 %v1392_v28, %v2162_v57  ;;  %v773_v31 = vpop.f32.mrf.mxu0  ;;  %v837_v60 = vpop.f32.mrf.mxu1  ;;  %v980_v13 = vmax.f32 %v978_v3, %v979_v41  ;;  %v885_v56 = vmax.f32 %v771_v25, 0.0  ;;  %v901_v7 = vmax.f32 %v835_v0, 0.0 }
 0x169   : > { %v917_v18 = vmax.f32 %v915_v55, %v916_v21  ;;  %v888_v47 = vmax.f32 %v782_v4, 0.0  ;;  %v774_v35 = vadd.f32 %v2162_v57, %v773_v31  ;;  %v838_v38 = vadd.f32 %v2162_v57, %v837_v60 }
 0x16a   : > { %v904_v23 = vmax.f32 %v846_v5, 0.0  ;;  %v1379_v8 = vpop.f32.mrf.mxu0  ;;  %v1395_v22 = vpop.f32.mrf.mxu1  ;;  %v925_v12 = vrot.slane %v924_v32, 2  ;;  %v973_v11 = vmax.f32 %v971_v16, %v972_v50  ;;  %v981_v24 = vrot.slane %v980_v13, 2 }
 0x16b   : > { %v936_v48 = vmax.f32 %v887_v46, %v888_v47  ;;  %v886_v63 = vmax.f32 %v774_v35, 0.0  ;;  %v902_v14 = vmax.f32 %v838_v38, 0.0  ;;  %v918_v40 = vrot.slane %v917_v18, 2 }
 0x16c   : > { %v786_v53 = vpop.f32.mrf.mxu0  ;;  %v850_v39 = vpop.f32.mrf.mxu1  ;;  %v992_v44 = vmax.f32 %v903_v10, %v904_v23  ;;  %v926_v29 = vmax.f32 %v924_v32, %v925_v12  ;;  %v974_v43 = vrot.slane %v973_v11, 2  ;;  %v982_v9 = vmax.f32 %v980_v13, %v981_v24 }
 0x16d   : > { %v929_v30 = vmax.f32 %v885_v56, %v886_v63  ;;  %v985_v45 = vmax.f32 %v901_v7, %v902_v14  ;;  %v937_v59 = vrot.slane %v936_v48, 4  ;;  %v919_v20 = vmax.f32 %v917_v18, %v918_v40 }
 0x16e   : > { %v1380_v42 = vpop.f32.mrf.mxu0  ;;  %v1396_v58 = vpop.f32.mrf.mxu1  ;;  %v993_v1 = vrot.slane %v992_v44, 4  ;;  %v795_v34 = vadd.f32 %v1379_v8, %v2162_v57  ;;  %v859_v2 = vadd.f32 %v1395_v22, %v2162_v57  ;;  %v927_v6 = vrot.slane %v926_v29, 1 }
 0x16f   : > { %v930_v49 = vrot.slane %v929_v30, 4  ;;  %v986_v36 = vrot.slane %v985_v45, 4  ;;  %v975_v15 = vmax.f32 %v973_v11, %v974_v43  ;;  %v938_v61 = vmax.f32 %v936_v48, %v937_v59 }
 0x170   : > { %v789_v52 = vpop.f32.mrf.mxu0  ;;  %v853_v19 = vpop.f32.mrf.mxu1  ;;  %v983_v62 = vrot.slane %v982_v9, 1  ;;  %v920_v26 = vrot.slane %v919_v20, 1  ;;  %v798_v54 = vadd.f32 %v1380_v42, %v2162_v57  ;;  %v862_v41 = vadd.f32 %v1396_v58, %v2162_v57 }
 0x171   : > { %v931_v51 = vmax.f32 %v929_v30, %v930_v49  ;;  %v987_v33 = vmax.f32 %v985_v45, %v986_v36  ;;  %v994_v55 = vmax.f32 %v992_v44, %v993_v1  ;;  %v891_v17 = vmax.f32 %v795_v34, 0.0 }
 0x172   : > { %v1383_v37 = vpop.f32.mrf.mxu0  ;;  %v1399_v3 = vpop.f32.mrf.mxu1  ;;  %v907_v28 = vmax.f32 %v859_v2, 0.0  ;;  %v787_v32 = vadd.f32 %v2162_v57, %v786_v53  ;;  %v892_v21 = vmax.f32 %v798_v54, 0.0  ;;  %v908_v25 = vmax.f32 %v862_v41, 0.0 }
 0x173   : > { %v932_v16 = vrot.slane %v931_v51, 2  ;;  %v988_v27 = vrot.slane %v987_v33, 2  ;;  %v2185_v4 = vmax.f32 %v926_v29, %v927_v6  ;;  %v976_v5 = vrot.slane %v975_v15, 1 }
 0x174   : > { %v802_v0 = vpop.f32.mrf.mxu0  ;;  %v866_v50 = vpop.f32.mrf.mxu1  ;;  %v939_v31 = vrot.slane %v938_v61, 2  ;;  %v851_v60 = vadd.f32 %v2162_v57, %v850_v39  ;;  %v950_v13 = vmax.f32 %v891_v17, %v892_v21  ;;  %v1006_v18 = vmax.f32 %v907_v28, %v908_v25 }
 0x175   : > { %v790_v46 = vadd.f32 %v2162_v57, %v789_v52  ;;  %v854_v47 = vadd.f32 %v2162_v57, %v853_v19  ;;  %v2190_v23 = vmax.f32 %v982_v9, %v983_v62  ;;  %v995_v35 = vrot.slane %v994_v55, 2 }
 0x176   : > { %v933_v38 = vmax.f32 %v931_v51, %v932_v16  ;;  %v2192_v8 = vmax.f32 %v987_v33, %v988_v27  ;;  %v2194_v22 = vmax.f32 %v919_v20, %v920_v26  ;;  %v889_v12 = vmax.f32 %v787_v32, 0.0  ;;  %v1384_v7 = vpop.f32.mrf.mxu0  ;;  %v1400_v11 = vpop.f32.mrf.mxu1 }
 0x177   : > { %v890_v10 = vmax.f32 %v790_v46, 0.0  ;;  %v906_v56 = vmax.f32 %v854_v47, 0.0  ;;  %v2196_v48 = vmax.f32 %v975_v15, %v976_v5  ;;  %v905_v63 = vmax.f32 %v851_v60, 0.0 }
 0x178   : > { %v811_v14 = vadd.f32 %v1383_v37, %v2162_v57  ;;  %v875_v53 = vadd.f32 %v1399_v3, %v2162_v57  ;;  %v2200_v39 = vmax.f32 %v938_v61, %v939_v31  ;;  %v951_v24 = vrot.slane %v950_v13, 4  ;;  %v805_v36 = vpop.f32.mrf.mxu0  ;;  %v869_v52 = vpop.f32.mrf.mxu1 }
 0x179   : > { %v1007_v40 = vrot.slane %v1006_v18, 4  ;;  %v943_v44 = vmax.f32 %v889_v12, %v890_v10  ;;  %v2202_v30 = vmax.f32 %v994_v55, %v995_v35  ;;  %v934_v45 = vrot.slane %v933_v38, 1 }
 0x17a   : > { %v990_v42 = vrot.slane %v2192_v8, 1  ;;  %v999_v58 = vmax.f32 %v905_v63, %v906_v56  ;;  %v803_v43 = vadd.f32 %v2162_v57, %v802_v0  ;;  %v867_v59 = vadd.f32 %v2162_v57, %v866_v50 }
 0x17b   : > { %v944_v29 = vrot.slane %v943_v44, 4  ;;  %v814_v49 = vadd.f32 %v1384_v7, %v2162_v57  ;;  %v895_v9 = vmax.f32 %v811_v14, 0.0  ;;  %v911_v20 = vmax.f32 %v875_v53, 0.0 }
 0x17c   : > { %v1000_v19 = vrot.slane %v999_v58, 4  ;;  %v878_v1 = vadd.f32 %v1400_v11, %v2162_v57  ;;  %v952_v51 = vmax.f32 %v950_v13, %v951_v24  ;;  %v1008_v33 = vmax.f32 %v1006_v18, %v1007_v40 }
 0x17d   : > { %v945_v34 = vmax.f32 %v943_v44, %v944_v29  ;;  %v896_v2 = vmax.f32 %v814_v49, 0.0  ;;  %v806_v6 = vadd.f32 %v2162_v57, %v805_v36  ;;  %v870_v15 = vadd.f32 %v2162_v57, %v869_v52 }
 0x17e   : > { %v1001_v37 = vmax.f32 %v999_v58, %v1000_v19  ;;  %v912_v3 = vmax.f32 %v878_v1, 0.0  ;;  %v893_v62 = vmax.f32 %v803_v43, 0.0  ;;  %v909_v26 = vmax.f32 %v867_v59, 0.0 }
 0x17f   : > { %v946_v61 = vrot.slane %v945_v34, 2  ;;  %v964_v54 = vmax.f32 %v895_v9, %v896_v2  ;;  %v894_v16 = vmax.f32 %v806_v6, 0.0  ;;  %v910_v27 = vmax.f32 %v870_v15, 0.0 }
 0x180   : > { %v1002_v41 = vrot.slane %v1001_v37, 2  ;;  %v1020_v55 = vmax.f32 %v911_v20, %v912_v3  ;;  %v953_v17 = vrot.slane %v952_v51, 2  ;;  %v1009_v28 = vrot.slane %v1008_v33, 2 }
 0x181   : > { %v947_v32 = vmax.f32 %v945_v34, %v946_v61  ;;  %v965_v21 = vrot.slane %v964_v54, 4  ;;  %v957_v50 = vmax.f32 %v893_v62, %v894_v16  ;;  %v1013_v5 = vmax.f32 %v909_v26, %v910_v27  ;;  %v914_v62 = vld [vmem:[#allocation2 + $0x8] sm:$0xff] }
 0x182   : > { %v1003_v25 = vmax.f32 %v1001_v37, %v1002_v41  ;;  %v1021_v0 = vrot.slane %v1020_v55, 4  ;;  %v941_v57 = vrot.slane %v2200_v39, 1  ;;  %v997_v31 = vrot.slane %v2202_v30, 1  ;;  %v913_v37 = vld [vmem:[#allocation2] sm:$0xff] }
 0x183   : > { %v935_v60 = vmax.f32 %v933_v38, %v934_v45  ;;  %v966_v13 = vmax.f32 %v964_v54, %v965_v21  ;;  %v948_v18 = vrot.slane %v947_v32, 1  ;;  %v958_v47 = vrot.slane %v957_v50, 4 }
 0x184   : > { %v1022_v46 = vmax.f32 %v1020_v55, %v1021_v0  ;;  %v1014_v35 = vrot.slane %v1013_v5, 4  ;;  %v991_v12 = vmax.f32 %v2192_v8, %v990_v42  ;;  %v954_v10 = vmax.f32 %v952_v51, %v953_v17 }
 0x185   : > { %v1004_v56 = vrot.slane %v1003_v25, 1  ;;  %v967_v7 = vrot.slane %v966_v13, 2  ;;  %v1010_v11 = vmax.f32 %v1008_v33, %v1009_v28  ;;  %v959_v14 = vmax.f32 %v957_v50, %v958_v47 }
 0x186   : > { %v1023_v63 = vrot.slane %v1022_v46, 2  ;;  %v1015_v53 = vmax.f32 %v1013_v5, %v1014_v35  ;;  %v1044_v24 = vsel %vm1043_vm0, %v2185_v4, %v2194_v22  ;;  %v1057_v38 = vsel %vm1043_vm0, %v2190_v23, %v2196_v48 }
 0x187   : > { %v942_v40 = vmax.f32 %v2200_v39, %v941_v57  ;;  %v968_v44 = vmax.f32 %v966_v13, %v967_v7  ;;  %v1046_v8 = vsel %vm1045_vm1, %v935_v60, %v1044_v24  ;;  %v949_v45 = vmax.f32 %v947_v32, %v948_v18 }
 0x188   : > { %v1024_v42 = vmax.f32 %v1022_v46, %v1023_v63  ;;  %v960_v58 = vrot.slane %v959_v14, 2  ;;  %v1058_v29 = vsel %vm1045_vm1, %v991_v12, %v1057_v38  ;;  %v955_v43 = vrot.slane %v954_v10, 1 }
 0x189   : > { %v1005_v59 = vmax.f32 %v1003_v25, %v1004_v56  ;;  %v1016_v49 = vrot.slane %v1015_v53, 2  ;;  %v998_v36 = vmax.f32 %v2202_v30, %v997_v31  ;;  %v1011_v4 = vrot.slane %v1010_v11, 1 }
 0x18a   : > { %v961_v22 = vmax.f32 %v959_v14, %v960_v58  ;;  %v1048_v52 = vsel %vm1047_vm2, %v942_v40, %v1046_v8  ;;  %v969_v23 = vrot.slane %v968_v44, 1  ;;  %v1025_v9 = vrot.slane %v1024_v42, 1 }
 0x18b   : > { %v1017_v48 = vmax.f32 %v1015_v53, %v1016_v49  ;;  %v1050_v39 = vsel %vm1049_vm3, %v949_v45, %v1048_v52  ;;  %v1059_v19 = vsel %vm1047_vm2, %v998_v36, %v1058_v29  ;;  %v956_v1 = vmax.f32 %v954_v10, %v955_v43 }
 0x18c   : > { %v962_v20 = vrot.slane %v961_v22, 1  ;;  %v1060_v51 = vsel %vm1049_vm3, %v1005_v59, %v1059_v19  ;;  %v1012_v34 = vmax.f32 %v1010_v11, %v1011_v4  ;;  %v970_v2 = vmax.f32 %v968_v44, %v969_v23 }
 0x18d   : > { %v1018_v33 = vrot.slane %v1017_v48, 1  ;;  %v1052_v3 = vsel %vm1051_vm4, %v956_v1, %v1050_v39  ;;  %v1026_v15 = vmax.f32 %v1024_v42, %v1025_v9 }
 0x18e   : > { %v963_v30 = vmax.f32 %v961_v22, %v962_v20  ;;  %v1061_v26 = vsel %vm1051_vm4, %v1012_v34, %v1060_v51 }
 0x18f   : > { %v1019_v6 = vmax.f32 %v1017_v48, %v1018_v33 }
 0x190   : > { %v1054_v61 = vsel %vm1053_vm5, %v963_v30, %v1052_v3 }
 0x191   : > { %v1056_v54 = vsel %vm1055_vm6, %v970_v2, %v1054_v61  ;;  %v1062_v41 = vsel %vm1053_vm5, %v1019_v6, %v1061_v26  ;;  %1073 = sbr.rel (%p1241_p2) target bundleno = 414 (0x19e), region = 56 }
 0x192   : > { %v1066_v55 = vmax.f32 %v913_v37, %v1056_v54  ;;  %v1063_v16 = vsel %vm1055_vm6, %v1026_v15, %v1062_v41 }
 0x193   : > { %v1067_v27 = vmax.f32 %v914_v62, %v1063_v16 }
 0x194   : > { %1068 = vst [vmem:[#allocation2] sm:$0xff] %v1066_v55 }
 0x195   : > { %1069 = vst [vmem:[#allocation2 + $0x8] sm:$0xff] %v1067_v27 }
 0x19b   : > { %v1074_v17 = vld [vmem:[#allocation2] sm:$0xff] }
 0x19c   : > { %v1075_v28 = vld [vmem:[#allocation2 + $0x8] sm:$0xff]  ;;  %1076 = vst [vmem:[%s1983_s8] sm:$0xff] %v1074_v17 }
 0x19d   : > { %1077 = vst [vmem:[%s1983_s8 + $0x8] sm:$0xff] %v1075_v28 }
 0x19e PF: > { %s2351_s29 = sld [smem:[#allocation19_spill]]  ;;  %s1092_s6 = sshll.u32 %s1983_s8, 4  ;;  %s2240_s6 = int_to_ptr.vmem [resolvable:$true] %s1092_s6 }
 0x19f   : > { %s2352_s12 = sld [smem:[#allocation25_spill]]  ;;  %s2244_s21 = scalar_lea.sflag [#allocation5], %s276_s2 }
 0x1a0   : > { %s2353_s7 = sld [smem:[#allocation29_spill]]  ;;  %s1610_s28 = scalar_lea.vmem %s2240_s6, 256 }
 0x1a1   : > { %p1611_p6 = scmp.ne.s32.totalorder %s2240_s6, %s1610_s28  ;;  %s1754_s18 = smov [#allocation9]  }
 0x1a2   : > { %s1614_s22 = sshll.u32 %s1754_s18, 4  ;;  %s1615_s22 = int_to_ptr.vmem [resolvable:$false] %s1614_s22 }
 0x1a3   : > { %s1616_s0 = scalar_lea.vmem %s1615_s22, 512  ;;  %p1617_p13 = scmp.lt.s32.totalorder %s2240_s6, %s1615_s22 }
 0x1a4   : > { %s1249_s5 = sshll.u32 %s2351_s29, 8  ;;  %p1618_p5 = scmp.lt.s32.totalorder %s1616_s0, %s1610_s28 }
 0x1a5   : > { %p2354_p7 = scmp.ne.s32.totalorder %s2352_s12, 0 }
 0x1a6   : > { %s2237_s20 = scalar_lea.hbm %s2353_s7, %s1249_s5  ;;  %p1619_p10 = por %p1618_p5, %p1617_p13 }
 0x1a7   : > { %p1612_p3 = pnand %p1611_p6, %p2354_p7 }
 0x1a9   : > { %p1613_p12 = pneg %p1612_p3 }
 0x1ab   : > { %p1620_p8 = pnand %p1619_p10, %p1613_p12 }
 0x1ad   : > { %1623 = shalt.err (!%p1620_p8)
}
 0x1ae   : > { %s1624_s15 = scalar_lea.hbm %s2237_s20, 256  ;;  %s1628_s11 = scalar_lea.hbm %s2353_s7, 1024 }
 0x1af   : > { %p1625_p0 = scmp.ne.s32.totalorder %s2237_s20, %s1624_s15  ;;  %p1629_p1 = scmp.lt.s32.totalorder %s2237_s20, %s2353_s7 }
 0x1b0   : > { %p1630_p4 = scmp.lt.s32.totalorder %s1628_s11, %s1624_s15 }
 0x1b1   : > { %p1626_p11 = pnand %p1625_p0, %p2354_p7 }
 0x1b2   : > { %p1631_p2 = por %p1630_p4, %p1629_p1 }
 0x1b3   : > { %p1627_p9 = pneg %p1626_p11 }
 0x1b5   : > { %p1632_p6 = pnand %p1631_p2, %p1627_p9 }
 0x1b7   : > { %1635 = shalt.err (!%p1632_p6)
}
 0x1b8   : > { %s1755_s23 = smov 128   ;;  %s1756_s4 = smov 8  }
 0x1b9   : > { %1432 = dma.vmem_to_hbm [thread:$0]  (%p2354_p7), %s2240_s6, 256, %s2237_s20, %s2244_s21, %s1755_s23, %s1755_s23, %s1756_s4  }
 0x1ba PF: > { %s2355_s8 = sld [smem:[#allocation17_spill]]  ;;  %p1444_p3 = scmp.ge.s32.totalorder %s1738_s25, 2 }
 0x1bb   : > { %s2356_s26 = sld [smem:[#allocation26_spill]] }
 0x1c0   : > { %s1107_s14 = sand.u32 1, %s2355_s8  }
 0x1c1   : > { %p2357_p12 = scmp.ne.s32.totalorder %s2356_s26, 0  ;;  %s1108_s29 = scalar_lea.sflag [#allocation5], %s1107_s14 }
 0x1c3   : > { %p1439_p13 = pnand %p1444_p3, %p2357_p12 }
 0x1c5   : > { %p1440_p5 = pneg %p1439_p13 }
 0x1c7   : > { %1693 = dma.done.wait (%p1440_p5), %s1108_s29, 256  }
 0x1c8   : > { %1695 = vsyncadd (%p1440_p5), %s1108_s29, 4294967040  ;;  %s23_s25 = sadd.s32 1, %s1738_s25   ;;  %s2358_s5 = sld [smem:[#allocation23_spill]] }
 0x1c9   : > { %p20_p10 = scmp.ge.s32.totalorder %s23_s25, 18   ;;  %s2359_s12 = sld [smem:[#allocation18_spill]] }
 0x1ca   : > { %s2360_s20 = sld [smem:[#allocation24_spill]]  ;;  %s2364_s15 = smov %s1702_s16 }
 0x1cb   : > { %s2361_s21 = sld [smem:[#allocation20_spill]]  ;;  %s2365_s16 = smov %s1706_s17 }
 0x1cc   : > { %s2362_s23 = sld [smem:[#allocation21_spill]]  ;;  %s2367_s18 = smov %s1714_s19 }
 0x1cd   : > { %s2363_s27 = sld [smem:[#allocation22_spill]]  ;;  %s2369_s22 = smov %s1734_s24 }
 0x1ce   : > { %s2366_s17 = smov %s2358_s5 }
 0x1cf   : > { %s2368_s19 = smov %s2359_s12  ;;  %22 = sbr.rel (!%p20_p10) target bundleno = 15 (0xf), region = 111 }
 0x1d3   : > { %s2370_s24 = smov %s2363_s27 }
 0x1d4   :  { %1113 = vsyncpa [#allocation4], 1 }
 0x1d5   :  { %1115 = vsyncpa [#allocation4 + $0x1], 1 }
 0x1d6   :  { %1116 = vsyncpa [#allocation7], 1 }
 0x1d7   :  { %1118 = vsyncpa [#allocation7 + $0x1], 1 }
 0x1d8   :  { %1119 = vsyncpa [#allocation5], 1 }
 0x1d9   :  { %1121 = vsyncpa [#allocation5 + $0x1], 1 }

</bundles_post_ra>
